<compile_context>
chip_gen: v6e
topology: v6e:2x2x1
jax: 0.10.0
libtpu: 0.0.40
codegen_flags: <defaults>
</compile_context>

<pallas_src>
import jax
import jax.numpy as jnp
from jax.experimental import pallas as pl
from jax.experimental.pallas import tpu as pltpu

EPS = 1e-8


def _round_up(x: int, m: int) -> int:
    return ((x + m - 1) // m) * m


def _cdiv(a: int, b: int) -> int:
    return -(-a // b)


def _vmem_capacity_bytes() -> int:
    """Physical VMEM per TensorCore; conservative fallback (v7x = 64 MiB)."""
    try:
        info = pltpu.get_tpu_info()
        cap = getattr(info, "vmem_capacity_bytes", None)
        if cap:
            return int(cap)
    except Exception:
        pass
    return 64 * 1024 * 1024


def _make_sdr_kernel(N: int, TR: int, TN: int, CHUNK: int, K_PER: int):
    """Build the partial-energy kernel for a fixed tiling.

    Grid: (split, row blocks, sample blocks).  The sample axis (last) is the
    reduction axis; (split, row) are independent ("parallel").

    x_ref, t_ref : (TR, TN) VMEM tiles of prediction / target (native dtype)
    te_ref       : (TR, 1) per-row target energy ||t||^2       (f32)
    ee_ref       : (TR, 1) per-row error  energy ||t - x||^2   (f32)
    te_acc/ee_acc: (TR, CHUNK) f32 per-lane accumulators (VMEM scratch)
    """
    n_chunks = TN // CHUNK

    def kernel(x_ref, t_ref, te_ref, ee_ref, te_acc, ee_acc):
        k = pl.program_id(2)
        # Logical (unclamped) sample-block index; the index_map clamps the DMA
        # source, the mask below zeroes any out-of-range contribution.
        kb = pl.program_id(0) * K_PER + k
        start = kb * TN

        @pl.when(k == 0)
        def _init():
            te_acc[...] = jnp.zeros_like(te_acc)
            ee_acc[...] = jnp.zeros_like(ee_acc)

        def accumulate(masked):
            if masked:
                lane = jax.lax.broadcasted_iota(jnp.int32, (TR, CHUNK), 1)
                limit = N - start            # traced scalar
            for j in range(n_chunks):
                sl = pl.ds(j * CHUNK, CHUNK)
                t = t_ref[:, sl].astype(jnp.float32)
                x = x_ref[:, sl].astype(jnp.float32)
                if masked:
                    valid = lane < (limit - j * CHUNK)
                    t = jnp.where(valid, t, 0.0)
                    x = jnp.where(valid, x, 0.0)
                e = t - x
                te_acc[...] += t * t
                ee_acc[...] += e * e

        # Fast path: block fully inside the valid sample range (no masking).
        @pl.when(start + TN <= N)
        def _full():
            accumulate(False)

        # Tail / clamped block: mask out-of-range lanes.
        @pl.when(start + TN > N)
        def _tail():
            accumulate(True)

        # Single cross-lane reduce + store per (split, row-block).
        @pl.when(k == K_PER - 1)
        def _finalize():
            te_ref[...] = jnp.sum(te_acc[...], axis=-1, keepdims=True)
            ee_ref[...] = jnp.sum(ee_acc[...], axis=-1, keepdims=True)

    return kernel


def sdr_loss(pred: jax.Array, target: jax.Array) -> jax.Array:
    """Pallas SDR loss. pred/target: (B, C, N) -> scalar float32."""
    assert pred.shape == target.shape and pred.ndim == 3
    assert pred.dtype == target.dtype
    B, C, N = pred.shape
    R = B * C
    itemsize = jnp.dtype(pred.dtype).itemsize
    sublane = {4: 8, 2: 16, 1: 32}.get(itemsize, 8)

    # ---- row block: dtype-aware sublane rounding, <= ~256 rows per block ----
    r_blocks = _cdiv(R, 256)
    tr = _round_up(_cdiv(R, r_blocks), sublane)
    r_blocks = _cdiv(R, tr)
    r_pad = r_blocks * tr            # output rows per split (input is NOT padded)

    # ---- sample tile ---------------------------------------------------------
    vmem_cap = _vmem_capacity_bytes()
    n128 = _round_up(N, 128)
    # Hard VMEM cap: 2 inputs x 2 pipeline buffers of (tr, tn) within ~35% of
    # capacity (in-kernel f32 temporaries are chunked and small).
    in_budget = int(vmem_cap * 0.35)
    tn_cap = max(128, (in_budget // (2 * 2 * tr * itemsize)) // 128 * 128)
    # Keep >= ~8 reduction steps when the data allows it (pipeline overlap) and
    # never exceed 8192 lanes; but aim for ~2 MiB per input block so per-step
    # DMA time dominates the fixed ~0.35us/step overhead.
    tn_upper = min(n128, tn_cap, max(1024, _round_up(_cdiv(n128, 8), 128)), 8192)
    tn_desired = max(2048, _round_up(max(1, (2 << 20) // (tr * itemsize)), 128))
    tn = max(128, min(tn_upper, tn_desired))
    if tn >= 512:
        tn = (tn // 512) * 512       # make the 512-lane chunking exact
    chunk = min(tn, 512)

    k_valid = _cdiv(N, tn)
    # Megacore: when the row grid alone cannot use v7x's 2nd TensorCore, split
    # the reduction range across a leading parallel axis of size 2.
    n_split = 2 if (r_blocks == 1 and k_valid >= 2) else 1
    k_per = _cdiv(k_valid, n_split)

    # ---- inputs: flatten only (no jnp.pad -> no extra HBM traffic) ----------
    x2 = pred.reshape(R, N)
    t2 = target.reshape(R, N)

    def in_map(c, r, k):
        # Clamp so a fully out-of-range block re-reads the last valid block
        # (its contribution is masked to zero in-kernel).
        return (r, jnp.minimum(c * k_per + k, k_valid - 1))

    def out_map(c, r, k):
        return (c * r_blocks + r, 0)

    # ---- VMEM limit: actual working set + headroom ---------------------------
    working = (2 * 2 * tr * tn * itemsize      # double-buffered input blocks
               + 2 * tr * chunk * 4            # per-lane f32 accumulators
               + 8 * tr * chunk * 4            # in-flight f32 chunk temporaries
               + 2 * 2 * tr * 4)               # double-buffered output blocks
    vmem_limit = int(min(vmem_cap * 0.8, working + (16 << 20)))

    cost = pl.CostEstimate(
        flops=int(6 * R * N),
        transcendentals=0,
        bytes_accessed=int(2 * R * N * itemsize + 2 * n_split * r_pad * 4),
    )

    out_rows = n_split * r_pad
    kernel = _make_sdr_kernel(N, tr, tn, chunk, k_per)

    te, ee = pl.pallas_call(
        kernel,
        out_shape=(
            jax.ShapeDtypeStruct((out_rows, 1), jnp.float32),
            jax.ShapeDtypeStruct((out_rows, 1), jnp.float32),
        ),
        grid_spec=pltpu.PrefetchScalarGridSpec(
            num_scalar_prefetch=0,
            grid=(n_split, r_blocks, k_per),
            in_specs=[
                pl.BlockSpec((tr, tn), in_map),
                pl.BlockSpec((tr, tn), in_map),
            ],
            out_specs=[
                pl.BlockSpec((tr, 1), out_map),
                pl.BlockSpec((tr, 1), out_map),
            ],
            scratch_shapes=[
                pltpu.VMEM((tr, chunk), jnp.float32),
                pltpu.VMEM((tr, chunk), jnp.float32),
            ],
        ),
        compiler_params=pltpu.CompilerParams(
            # split & rows: independent (v7x shards across its 2 TCs);
            # samples: reduction axis, kept last.
            dimension_semantics=("parallel", "parallel", "arbitrary"),
            vmem_limit_bytes=vmem_limit,
        ),
        cost_estimate=cost,
    )(x2, t2)

    # ---- tiny epilogue in plain JAX ------------------------------------------
    # Drop garbage rows (past R) of each split BEFORE summing splits.
    te = te.reshape(n_split, r_pad)[:, :R].sum(axis=0)
    ee = ee.reshape(n_split, r_pad)[:, :R].sum(axis=0)
    sdr = 10.0 * jnp.log10(te / (ee + EPS) + EPS)
    return -jnp.mean(sdr)


def _sdr_loss_ref(pred, target):
    """Pure-JAX reference for validation."""
    t = target.astype(jnp.float32)
    x = pred.astype(jnp.float32)
    t_e = jnp.sum(t * t, axis=-1)
    e_e = jnp.sum((t - x) ** 2, axis=-1)
    sdr = 10.0 * jnp.log10(t_e / (e_e + EPS) + EPS)
    return -jnp.mean(sdr)


if __name__ == "__main__":
    key = jax.random.PRNGKey(0)
    jit_loss = jax.jit(sdr_loss)

    # Case 1: aligned shapes, f32 (B, #channels, #samples).
    B, C, N = 2, 4, 2048
    k1, k2 = jax.random.split(key)
    target = jax.random.normal(k1, (B, C, N), dtype=jnp.float32)
    pred = target + 0.1 * jax.random.normal(k2, (B, C, N), dtype=jnp.float32)
    loss = jax.block_until_ready(jit_loss(pred, target))
    ref = _sdr_loss_ref(pred, target)
    assert jnp.allclose(loss, ref, rtol=1e-4, atol=1e-4), (loss, ref)

    # Case 2: ragged shapes (exercise in-kernel tail masking, no padding).
    B2, C2, N2 = 2, 3, 1000
    k3, k4 = jax.random.split(k2)
    target2 = jax.random.normal(k3, (B2, C2, N2), dtype=jnp.float32)
    pred2 = target2 + 0.2 * jax.random.normal(k4, (B2, C2, N2), dtype=jnp.float32)
    loss2 = jax.block_until_ready(jit_loss(pred2, target2))
    ref2 = _sdr_loss_ref(pred2, target2)
    assert jnp.allclose(loss2, ref2, rtol=1e-4, atol=1e-4), (loss2, ref2)

    # Case 3: bf16 inputs fed natively (kernel casts to f32 in-register).
    target3 = target.astype(jnp.bfloat16)
    pred3 = pred.astype(jnp.bfloat16)
    loss3 = jax.block_until_ready(jit_loss(pred3, target3))
    ref3 = _sdr_loss_ref(pred3, target3)
    assert jnp.allclose(loss3, ref3, rtol=1e-2, atol=1e-2), (loss3, ref3)

    print("KERNEL_OK")
</pallas_src>

<mosaic_0001>
module attributes {stable_mosaic.version = 11 : i64} {
  func.func @kernel(%arg0: i32, %arg1: i32, %arg2: i32, %arg3: memref<8x1024xf32, #tpu.memory_space<vmem>>, %arg4: memref<8x1024xf32, #tpu.memory_space<vmem>>, %arg5: memref<8x1xf32, #tpu.memory_space<vmem>>, %arg6: memref<8x1xf32, #tpu.memory_space<vmem>>, %arg7: memref<8x512xf32, #tpu.memory_space<vmem>>, %arg8: memref<8x512xf32, #tpu.memory_space<vmem>>) attributes {dimension_semantics = [#tpu.dimension_semantics<parallel>, #tpu.dimension_semantics<parallel>, #tpu.dimension_semantics<arbitrary>], iteration_bounds = array<i64: 2, 1, 1>, scalar_prefetch = 0 : i64, scratch_operands = 2 : i64, tpu.core_type = #tpu.core_type<tc>, window_params = [{transform_indices = @transform_0, window_bounds = array<i64: 8, 1024>}, {transform_indices = @transform_1, window_bounds = array<i64: 8, 1024>}, {transform_indices = @transform_2, window_bounds = array<i64: 8, 1>}, {transform_indices = @transform_3, window_bounds = array<i64: 8, 1>}]} {
    %c1_i32 = arith.constant 1 : i32
    %0 = arith.muli %arg0, %c1_i32 : i32
    %1 = arith.addi %0, %arg2 : i32
    %c1024_i32 = arith.constant 1024 : i32
    %2 = arith.muli %1, %c1024_i32 : i32
    %c0_i32 = arith.constant 0 : i32
    %3 = arith.cmpi eq, %arg2, %c0_i32 : i32
    %4 = arith.extui %3 : i1 to i32
    %c0_i32_0 = arith.constant 0 : i32
    %5 = arith.cmpi ne, %4, %c0_i32_0 : i32
    scf.if %5 {
      %cst = arith.constant 0.000000e+00 : f32
      %17 = vector.broadcast %cst : f32 to vector<8x512xf32>
      %c0 = arith.constant 0 : index
      %c0_8 = arith.constant 0 : index
      %18 = vector.load %arg7[%c0, %c0_8] : memref<8x512xf32, #tpu.memory_space<vmem>>, vector<8x512xf32>
      tpu.vector_store %arg7[%c0, %c0_8], %17 {strides = array<i32>} : memref<8x512xf32, #tpu.memory_space<vmem>>, vector<8x512xf32>,
      %cst_9 = arith.constant 0.000000e+00 : f32
      %19 = vector.broadcast %cst_9 : f32 to vector<8x512xf32>
      %c0_10 = arith.constant 0 : index
      %c0_11 = arith.constant 0 : index
      %20 = vector.load %arg8[%c0_10, %c0_11] : memref<8x512xf32, #tpu.memory_space<vmem>>, vector<8x512xf32>
      tpu.vector_store %arg8[%c0_10, %c0_11], %19 {strides = array<i32>} : memref<8x512xf32, #tpu.memory_space<vmem>>, vector<8x512xf32>,
    } else {
    }
    %c1024_i32_1 = arith.constant 1024 : i32
    %6 = arith.addi %2, %c1024_i32_1 : i32
    %c2048_i32 = arith.constant 2048 : i32
    %7 = arith.cmpi sle, %6, %c2048_i32 : i32
    %8 = arith.extui %7 : i1 to i32
    %c0_i32_2 = arith.constant 0 : i32
    %9 = arith.cmpi ne, %8, %c0_i32_2 : i32
    scf.if %9 {
      %c0 = arith.constant 0 : index
      %c0_8 = arith.constant 0 : index
      %17 = vector.load %arg4[%c0, %c0_8] : memref<8x1024xf32, #tpu.memory_space<vmem>>, vector<8x512xf32>
      %c0_9 = arith.constant 0 : index
      %c0_10 = arith.constant 0 : index
      %18 = vector.load %arg3[%c0_9, %c0_10] : memref<8x1024xf32, #tpu.memory_space<vmem>>, vector<8x512xf32>
      %19 = arith.subf %17, %18 : vector<8x512xf32>
      %c0_11 = arith.constant 0 : index
      %c0_12 = arith.constant 0 : index
      %20 = vector.load %arg7[%c0_11, %c0_12] : memref<8x512xf32, #tpu.memory_space<vmem>>, vector<8x512xf32>
      %21 = arith.mulf %17, %17 : vector<8x512xf32>
      %22 = arith.addf %20, %21 : vector<8x512xf32>
      %c0_13 = arith.constant 0 : index
      %c0_14 = arith.constant 0 : index
      %23 = vector.load %arg7[%c0_13, %c0_14] : memref<8x512xf32, #tpu.memory_space<vmem>>, vector<8x512xf32>
      tpu.vector_store %arg7[%c0_13, %c0_14], %22 {strides = array<i32>} : memref<8x512xf32, #tpu.memory_space<vmem>>, vector<8x512xf32>,
      %c0_15 = arith.constant 0 : index
      %c0_16 = arith.constant 0 : index
      %24 = vector.load %arg8[%c0_15, %c0_16] : memref<8x512xf32, #tpu.memory_space<vmem>>, vector<8x512xf32>
      %25 = arith.mulf %19, %19 : vector<8x512xf32>
      %26 = arith.addf %24, %25 : vector<8x512xf32>
      %c0_17 = arith.constant 0 : index
      %c0_18 = arith.constant 0 : index
      %27 = vector.load %arg8[%c0_17, %c0_18] : memref<8x512xf32, #tpu.memory_space<vmem>>, vector<8x512xf32>
      tpu.vector_store %arg8[%c0_17, %c0_18], %26 {strides = array<i32>} : memref<8x512xf32, #tpu.memory_space<vmem>>, vector<8x512xf32>,
      %c0_19 = arith.constant 0 : index
      %c512 = arith.constant 512 : index
      %28 = vector.load %arg4[%c0_19, %c512] : memref<8x1024xf32, #tpu.memory_space<vmem>>, vector<8x512xf32>
      %c0_20 = arith.constant 0 : index
      %c512_21 = arith.constant 512 : index
      %29 = vector.load %arg3[%c0_20, %c512_21] : memref<8x1024xf32, #tpu.memory_space<vmem>>, vector<8x512xf32>
      %30 = arith.subf %28, %29 : vector<8x512xf32>
      %c0_22 = arith.constant 0 : index
      %c0_23 = arith.constant 0 : index
      %31 = vector.load %arg7[%c0_22, %c0_23] : memref<8x512xf32, #tpu.memory_space<vmem>>, vector<8x512xf32>
      %32 = arith.mulf %28, %28 : vector<8x512xf32>
      %33 = arith.addf %31, %32 : vector<8x512xf32>
      %c0_24 = arith.constant 0 : index
      %c0_25 = arith.constant 0 : index
      %34 = vector.load %arg7[%c0_24, %c0_25] : memref<8x512xf32, #tpu.memory_space<vmem>>, vector<8x512xf32>
      tpu.vector_store %arg7[%c0_24, %c0_25], %33 {strides = array<i32>} : memref<8x512xf32, #tpu.memory_space<vmem>>, vector<8x512xf32>,
      %c0_26 = arith.constant 0 : index
      %c0_27 = arith.constant 0 : index
      %35 = vector.load %arg8[%c0_26, %c0_27] : memref<8x512xf32, #tpu.memory_space<vmem>>, vector<8x512xf32>
      %36 = arith.mulf %30, %30 : vector<8x512xf32>
      %37 = arith.addf %35, %36 : vector<8x512xf32>
      %c0_28 = arith.constant 0 : index
      %c0_29 = arith.constant 0 : index
      %38 = vector.load %arg8[%c0_28, %c0_29] : memref<8x512xf32, #tpu.memory_space<vmem>>, vector<8x512xf32>
      tpu.vector_store %arg8[%c0_28, %c0_29], %37 {strides = array<i32>} : memref<8x512xf32, #tpu.memory_space<vmem>>, vector<8x512xf32>,
    } else {
    }
    %c1024_i32_3 = arith.constant 1024 : i32
    %10 = arith.addi %2, %c1024_i32_3 : i32
    %c2048_i32_4 = arith.constant 2048 : i32
    %11 = arith.cmpi sgt, %10, %c2048_i32_4 : i32
    %12 = arith.extui %11 : i1 to i32
    %c0_i32_5 = arith.constant 0 : i32
    %13 = arith.cmpi ne, %12, %c0_i32_5 : i32
    scf.if %13 {
      %17 = tpu.iota {dimensions = array<i32: 1>} : vector<8x512xi32>
      %c2048_i32_8 = arith.constant 2048 : i32
      %18 = arith.subi %c2048_i32_8, %2 : i32
      %c0 = arith.constant 0 : index
      %c0_9 = arith.constant 0 : index
      %19 = vector.load %arg4[%c0, %c0_9] : memref<8x1024xf32, #tpu.memory_space<vmem>>, vector<8x512xf32>
      %c0_10 = arith.constant 0 : index
      %c0_11 = arith.constant 0 : index
      %20 = vector.load %arg3[%c0_10, %c0_11] : memref<8x1024xf32, #tpu.memory_space<vmem>>, vector<8x512xf32>
      %c0_i32_12 = arith.constant 0 : i32
      %21 = arith.subi %18, %c0_i32_12 : i32
      %22 = vector.broadcast %21 : i32 to vector<8x512xi32>
      %23 = arith.cmpi slt, %17, %22 : vector<8x512xi32>
      %cst = arith.constant 0.000000e+00 : f32
      %24 = vector.broadcast %cst : f32 to vector<8x512xf32>
      %25 = arith.select %23, %19, %24 : vector<8x512xi1>, vector<8x512xf32>
      %cst_13 = arith.constant 0.000000e+00 : f32
      %26 = vector.broadcast %cst_13 : f32 to vector<8x512xf32>
      %27 = arith.select %23, %20, %26 : vector<8x512xi1>, vector<8x512xf32>
      %28 = arith.subf %25, %27 : vector<8x512xf32>
      %c0_14 = arith.constant 0 : index
      %c0_15 = arith.constant 0 : index
      %29 = vector.load %arg7[%c0_14, %c0_15] : memref<8x512xf32, #tpu.memory_space<vmem>>, vector<8x512xf32>
      %30 = arith.mulf %25, %25 : vector<8x512xf32>
      %31 = arith.addf %29, %30 : vector<8x512xf32>
      %c0_16 = arith.constant 0 : index
      %c0_17 = arith.constant 0 : index
      %32 = vector.load %arg7[%c0_16, %c0_17] : memref<8x512xf32, #tpu.memory_space<vmem>>, vector<8x512xf32>
      tpu.vector_store %arg7[%c0_16, %c0_17], %31 {strides = array<i32>} : memref<8x512xf32, #tpu.memory_space<vmem>>, vector<8x512xf32>,
      %c0_18 = arith.constant 0 : index
      %c0_19 = arith.constant 0 : index
      %33 = vector.load %arg8[%c0_18, %c0_19] : memref<8x512xf32, #tpu.memory_space<vmem>>, vector<8x512xf32>
      %34 = arith.mulf %28, %28 : vector<8x512xf32>
      %35 = arith.addf %33, %34 : vector<8x512xf32>
      %c0_20 = arith.constant 0 : index
      %c0_21 = arith.constant 0 : index
      %36 = vector.load %arg8[%c0_20, %c0_21] : memref<8x512xf32, #tpu.memory_space<vmem>>, vector<8x512xf32>
      tpu.vector_store %arg8[%c0_20, %c0_21], %35 {strides = array<i32>} : memref<8x512xf32, #tpu.memory_space<vmem>>, vector<8x512xf32>,
      %c0_22 = arith.constant 0 : index
      %c512 = arith.constant 512 : index
      %37 = vector.load %arg4[%c0_22, %c512] : memref<8x1024xf32, #tpu.memory_space<vmem>>, vector<8x512xf32>
      %c0_23 = arith.constant 0 : index
      %c512_24 = arith.constant 512 : index
      %38 = vector.load %arg3[%c0_23, %c512_24] : memref<8x1024xf32, #tpu.memory_space<vmem>>, vector<8x512xf32>
      %c512_i32 = arith.constant 512 : i32
      %39 = arith.subi %18, %c512_i32 : i32
      %40 = vector.broadcast %39 : i32 to vector<8x512xi32>
      %41 = arith.cmpi slt, %17, %40 : vector<8x512xi32>
      %cst_25 = arith.constant 0.000000e+00 : f32
      %42 = vector.broadcast %cst_25 : f32 to vector<8x512xf32>
      %43 = arith.select %41, %37, %42 : vector<8x512xi1>, vector<8x512xf32>
      %cst_26 = arith.constant 0.000000e+00 : f32
      %44 = vector.broadcast %cst_26 : f32 to vector<8x512xf32>
      %45 = arith.select %41, %38, %44 : vector<8x512xi1>, vector<8x512xf32>
      %46 = arith.subf %43, %45 : vector<8x512xf32>
      %c0_27 = arith.constant 0 : index
      %c0_28 = arith.constant 0 : index
      %47 = vector.load %arg7[%c0_27, %c0_28] : memref<8x512xf32, #tpu.memory_space<vmem>>, vector<8x512xf32>
      %48 = arith.mulf %43, %43 : vector<8x512xf32>
      %49 = arith.addf %47, %48 : vector<8x512xf32>
      %c0_29 = arith.constant 0 : index
      %c0_30 = arith.constant 0 : index
      %50 = vector.load %arg7[%c0_29, %c0_30] : memref<8x512xf32, #tpu.memory_space<vmem>>, vector<8x512xf32>
      tpu.vector_store %arg7[%c0_29, %c0_30], %49 {strides = array<i32>} : memref<8x512xf32, #tpu.memory_space<vmem>>, vector<8x512xf32>,
      %c0_31 = arith.constant 0 : index
      %c0_32 = arith.constant 0 : index
      %51 = vector.load %arg8[%c0_31, %c0_32] : memref<8x512xf32, #tpu.memory_space<vmem>>, vector<8x512xf32>
      %52 = arith.mulf %46, %46 : vector<8x512xf32>
      %53 = arith.addf %51, %52 : vector<8x512xf32>
      %c0_33 = arith.constant 0 : index
      %c0_34 = arith.constant 0 : index
      %54 = vector.load %arg8[%c0_33, %c0_34] : memref<8x512xf32, #tpu.memory_space<vmem>>, vector<8x512xf32>
      tpu.vector_store %arg8[%c0_33, %c0_34], %53 {strides = array<i32>} : memref<8x512xf32, #tpu.memory_space<vmem>>, vector<8x512xf32>,
    } else {
    }
    %c0_i32_6 = arith.constant 0 : i32
    %14 = arith.cmpi eq, %arg2, %c0_i32_6 : i32
    %15 = arith.extui %14 : i1 to i32
    %c0_i32_7 = arith.constant 0 : i32
    %16 = arith.cmpi ne, %15, %c0_i32_7 : i32
    scf.if %16 {
      %c0 = arith.constant 0 : index
      %c0_8 = arith.constant 0 : index
      %17 = vector.load %arg7[%c0, %c0_8] : memref<8x512xf32, #tpu.memory_space<vmem>>, vector<8x512xf32>
      %cst = arith.constant dense<0.000000e+00> : vector<8xf32>
      %18 = vector.multi_reduction <add>, %17, %cst [1] : vector<8x512xf32> to vector<8xf32>
      %19 = vector.shape_cast %18 : vector<8xf32> to vector<8x1xf32>
      %c0_9 = arith.constant 0 : index
      %c0_10 = arith.constant 0 : index
      %20 = vector.load %arg5[%c0_9, %c0_10] : memref<8x1xf32, #tpu.memory_space<vmem>>, vector<8x1xf32>
      tpu.vector_store %arg5[%c0_9, %c0_10], %19 {strides = array<i32>} : memref<8x1xf32, #tpu.memory_space<vmem>>, vector<8x1xf32>,
      %c0_11 = arith.constant 0 : index
      %c0_12 = arith.constant 0 : index
      %21 = vector.load %arg8[%c0_11, %c0_12] : memref<8x512xf32, #tpu.memory_space<vmem>>, vector<8x512xf32>
      %cst_13 = arith.constant dense<0.000000e+00> : vector<8xf32>
      %22 = vector.multi_reduction <add>, %21, %cst_13 [1] : vector<8x512xf32> to vector<8xf32>
      %23 = vector.shape_cast %22 : vector<8xf32> to vector<8x1xf32>
      %c0_14 = arith.constant 0 : index
      %c0_15 = arith.constant 0 : index
      %24 = vector.load %arg6[%c0_14, %c0_15] : memref<8x1xf32, #tpu.memory_space<vmem>>, vector<8x1xf32>
      tpu.vector_store %arg6[%c0_14, %c0_15], %23 {strides = array<i32>} : memref<8x1xf32, #tpu.memory_space<vmem>>, vector<8x1xf32>,
    } else {
    }
    return
  }
  func.func @transform_0(%arg0: i32, %arg1: i32, %arg2: i32) -> (i32, i32) {
    %c1_i32 = arith.constant 1 : i32
    %0 = arith.muli %arg0, %c1_i32 : i32
    %1 = arith.addi %0, %arg2 : i32
    %c1_i32_0 = arith.constant 1 : i32
    %2 = arith.minsi %1, %c1_i32_0 : i32
    %c0_i32 = arith.constant 0 : i32
    return %arg1, %2 : i32, i32
  }
  func.func @transform_1(%arg0: i32, %arg1: i32, %arg2: i32) -> (i32, i32) {
    %c1_i32 = arith.constant 1 : i32
    %0 = arith.muli %arg0, %c1_i32 : i32
    %1 = arith.addi %0, %arg2 : i32
    %c1_i32_0 = arith.constant 1 : i32
    %2 = arith.minsi %1, %c1_i32_0 : i32
    %c0_i32 = arith.constant 0 : i32
    return %arg1, %2 : i32, i32
  }
  func.func @transform_2(%arg0: i32, %arg1: i32, %arg2: i32) -> (i32, i32) {
    %c1_i32 = arith.constant 1 : i32
    %0 = arith.muli %arg0, %c1_i32 : i32
    %1 = arith.addi %0, %arg1 : i32
    %c0_i32 = arith.constant 0 : i32
    %c0_i32_0 = arith.constant 0 : i32
    return %1, %c0_i32 : i32, i32
  }
  func.func @transform_3(%arg0: i32, %arg1: i32, %arg2: i32) -> (i32, i32) {
    %c1_i32 = arith.constant 1 : i32
    %0 = arith.muli %arg0, %c1_i32 : i32
    %1 = arith.addi %0, %arg1 : i32
    %c0_i32 = arith.constant 0 : i32
    %c0_i32_0 = arith.constant 0 : i32
    return %1, %c0_i32 : i32, i32
  }
}

</mosaic_0001>

<bundles_post_ra>
// kernel: sdr_loss.1
= control target key start
LH: loop header
LB: loop body
LE: loop exit
PB: predicated region body
PF: predicated region fallthrough
CT: control target
= control target key end

     0   :  { %s771_s12 = smov 0   ;;  %s773_s13 = smov 0   ;;  %s926_s0 = inlined_call_operand.vmem [shape: f32[8,2048], index: 0, kind: input, shape index: {}]   ;;  %s927_s1 = inlined_call_operand.vmem [shape: f32[8,2048], index: 1, kind: input, shape index: {}]   ;;  %s928_s2 = inlined_call_operand.vmem [shape: f32[16,1], index: 2, kind: output, shape index: {0}]   ;;  %s929_s3 = inlined_call_operand.vmem [shape: f32[16,1], index: 3, kind: output, shape index: {1}]  }
   0x1   :  { %s775_s14 = smov 0  }
   0x2 LB: > { %s33_s15 = sadd.s32 1, %s744_s13  ;;  %p689_p0 = scmp.ge.s32.totalorder %s748_s14, 1  ;;  %s748_s14 = sphi %s775_s14, %s14_s14   ;;  %s744_s13 = sphi %s773_s13, %s931_s13   ;;  %s740_s12 = sphi %s771_s12, %s930_s12  }
   0x3   : > { %p35_p1 = scmp.ge.s32.totalorder %s33_s15, 2  ;;  %p211_p2 = scmp.lt.s32.totalorder %s748_s14, 3 }
   0x5   : > { %s933_s15 = smov (%p35_p1, %s33_s15), 0  ;;  %p212_p3 = pnand %p689_p0, %p211_p2 }
   0x6   : > { %p260_p4 = scmp.lt.s32.totalorder (!%p212_p3), %s740_s12, 1  ;;  %s789_s16 = sshll.u32 (!%p212_p3), %s740_s12, 10 }
   0x7   : > { %215 = sbr.rel (%p212_p3) target bundleno = 222 (0xde), region = 28  ;;  %s317_s17 = sadd.s32 (!%p212_p3), 1024, %s789_s16 }
   0x8   : > { %p697_p6 = scmp.gt.s32.totalorder (!%p212_p3), %s317_s17, 2048 }
   0xc   : > { %v750_v0 = vmov 0.0   ;;  %s935_s12 = smov (!%p260_p4, %s740_s12), 1 }
   0xd   : > { %309 = vst [vmem:[#allocation2 + $0x10] sm:$0xff] %v750_v0  ;;  %310 = vst [vmem:[#allocation2] sm:$0xff] %v750_v0  ;;  %s792_s18 = sshll.u32 %s935_s12, 3 }
   0xe   : > { %311 = vst [vmem:[#allocation2 + $0x18] sm:$0xff] %v750_v0  ;;  %312 = vst [vmem:[#allocation2 + $0x8] sm:$0xff] %v750_v0  ;;  %p265_p5 = scmp.lt.s32.totalorder %s792_s18, 15  ;;  %s295_s21 = scalar_lea.vmem %s928_s2, %s792_s18 }
   0xf   : > { %313 = vst [vmem:[#allocation3] sm:$0xff] %v750_v0  ;;  %314 = vst [vmem:[#allocation3 + $0x18] sm:$0xff] %v750_v0  ;;  %s301_s24 = scalar_lea.vmem %s929_s3, %s792_s18  ;;  %321 = sbr.rel (%p697_p6) target bundleno = 38 (0x26), region = 36 }
  0x10   : > { %315 = vst [vmem:[#allocation3 + $0x8] sm:$0xff] %v750_v0  ;;  %316 = vst [vmem:[#allocation3 + $0x10] sm:$0xff] %v750_v0  ;;  %s266_s25 = scalar_select %p265_p5, %s792_s18, 15 }
  0x12   : > { %s691_s26 = sshll.u32 %s266_s25, 3 }
  0x13   : > { %s807_s29 = scalar_lea.vmem %s926_s0, %s691_s26  ;;  %s812_s5 = scalar_lea.vmem %s927_s1, %s691_s26 }
  0x14   : > { %v322_v1 = vld [vmem:[%s812_s5] sm:$0xff]  ;;  %v334_v2 = vld [vmem:[#allocation2 + $0x10] sm:$0xff]  ;;  %v323_v3 = vld [vmem:[%s812_s5 + $0x8] sm:$0xff] }
  0x15   : > { %v338_v4 = vmul.f32 %v322_v1, %v322_v1  ;;  %v335_v5 = vld [vmem:[#allocation2] sm:$0xff]  ;;  %v339_v6 = vmul.f32 %v323_v3, %v323_v3  ;;  %v324_v7 = vld [vmem:[%s812_s5 + $0x10] sm:$0xff]  ;;  %v336_v8 = vld [vmem:[#allocation2 + $0x18] sm:$0xff] }
  0x16   : > { %v340_v9 = vmul.f32 %v324_v7, %v324_v7  ;;  %v325_v10 = vld [vmem:[%s812_s5 + $0x18] sm:$0xff]  ;;  %v337_v11 = vld [vmem:[#allocation2 + $0x8] sm:$0xff]  ;;  %v326_v12 = vld [vmem:[%s807_s29] sm:$0xff] }
  0x17   : > { %v341_v13 = vmul.f32 %v325_v10, %v325_v10  ;;  %v330_v14 = vsub.f32 %v322_v1, %v326_v12  ;;  %v350_v15 = vld [vmem:[#allocation3] sm:$0xff]  ;;  %v327_v16 = vld [vmem:[%s807_s29 + $0x8] sm:$0xff]  ;;  %v351_v17 = vld [vmem:[#allocation3 + $0x18] sm:$0xff]  ;;  %v342_v18 = vadd.f32 %v338_v4, %v334_v2  ;;  %v343_v19 = vadd.f32 %v339_v6, %v335_v5 }
  0x18   : > { %v331_v20 = vsub.f32 %v323_v3, %v327_v16  ;;  %v328_v21 = vld [vmem:[%s807_s29 + $0x10] sm:$0xff]  ;;  %v352_v22 = vld [vmem:[#allocation3 + $0x8] sm:$0xff]  ;;  %v329_v23 = vld [vmem:[%s807_s29 + $0x18] sm:$0xff]  ;;  %v344_v24 = vadd.f32 %v340_v9, %v336_v8 }
  0x19   : > { %v354_v25 = vmul.f32 %v330_v14, %v330_v14  ;;  %v332_v26 = vsub.f32 %v324_v7, %v328_v21  ;;  %v333_v27 = vsub.f32 %v325_v10, %v329_v23  ;;  %v353_v28 = vld [vmem:[#allocation3 + $0x10] sm:$0xff]  ;;  %v366_v29 = vld [vmem:[%s812_s5 + $0x20] sm:$0xff]  ;;  %v367_v30 = vld [vmem:[%s812_s5 + $0x28] sm:$0xff]  ;;  %v345_v31 = vadd.f32 %v341_v13, %v337_v11 }
  0x1a   : > { %v355_v32 = vmul.f32 %v331_v20, %v331_v20  ;;  %v382_v33 = vmul.f32 %v366_v29, %v366_v29  ;;  %v383_v34 = vmul.f32 %v367_v30, %v367_v30  ;;  %v368_v35 = vld [vmem:[%s812_s5 + $0x30] sm:$0xff]  ;;  %v369_v36 = vld [vmem:[%s812_s5 + $0x38] sm:$0xff]  ;;  %v370_v37 = vld [vmem:[%s807_s29 + $0x20] sm:$0xff] }
  0x1b   : > { %v358_v38 = vadd.f32 %v354_v25, %v350_v15  ;;  %v356_v39 = vmul.f32 %v332_v26, %v332_v26  ;;  %v357_v40 = vmul.f32 %v333_v27, %v333_v27  ;;  %v384_v41 = vmul.f32 %v368_v35, %v368_v35  ;;  %v371_v42 = vld [vmem:[%s807_s29 + $0x28] sm:$0xff]  ;;  %v372_v43 = vld [vmem:[%s807_s29 + $0x30] sm:$0xff]  ;;  %v373_v44 = vld [vmem:[%s807_s29 + $0x38] sm:$0xff] }
  0x1c   : > { %v359_v45 = vadd.f32 %v355_v32, %v351_v17  ;;  %v386_v46 = vadd.f32 %v382_v33, %v342_v18  ;;  %v387_v47 = vadd.f32 %v383_v34, %v343_v19  ;;  %v385_v48 = vmul.f32 %v369_v36, %v369_v36 }
  0x1d   : > { %v360_v49 = vadd.f32 %v356_v39, %v352_v22  ;;  %v361_v50 = vadd.f32 %v357_v40, %v353_v28  ;;  %v388_v51 = vadd.f32 %v384_v41, %v344_v24  ;;  %v374_v52 = vsub.f32 %v366_v29, %v370_v37 }
  0x1e   : > { %390 = vst [vmem:[#allocation2 + $0x10] sm:$0xff] %v386_v46  ;;  %391 = vst [vmem:[#allocation2] sm:$0xff] %v387_v47  ;;  %v389_v53 = vadd.f32 %v385_v48, %v345_v31  ;;  %v375_v54 = vsub.f32 %v367_v30, %v371_v42  ;;  %v376_v55 = vsub.f32 %v368_v35, %v372_v43 }
  0x1f   : > { %v377_v56 = vsub.f32 %v369_v36, %v373_v44  ;;  %392 = vst [vmem:[#allocation2 + $0x18] sm:$0xff] %v388_v51  ;;  %v398_v57 = vmul.f32 %v374_v52, %v374_v52 }
  0x20   : > { %393 = vst [vmem:[#allocation2 + $0x8] sm:$0xff] %v389_v53  ;;  %v399_v58 = vmul.f32 %v375_v54, %v375_v54  ;;  %v400_v59 = vmul.f32 %v376_v55, %v376_v55 }
  0x21   : > { %v401_v60 = vmul.f32 %v377_v56, %v377_v56  ;;  %v402_v61 = vadd.f32 %v398_v57, %v358_v38 }
  0x22   : > { %v403_v62 = vadd.f32 %v399_v58, %v359_v45  ;;  %v404_v63 = vadd.f32 %v400_v59, %v360_v49 }
  0x23   : > { %v405_v0 = vadd.f32 %v401_v60, %v361_v50  ;;  %406 = vst [vmem:[#allocation3] sm:$0xff] %v402_v61 }
  0x24   : > { %407 = vst [vmem:[#allocation3 + $0x18] sm:$0xff] %v403_v62  ;;  %408 = vst [vmem:[#allocation3 + $0x8] sm:$0xff] %v404_v63 }
  0x25   : > { %409 = vst [vmem:[#allocation3 + $0x10] sm:$0xff] %v405_v0 }
  0x26 PF: > { %p698_p7 = scmp.le.s32.totalorder %s317_s17, 2048 }
  0x27   : > { %s419_s6 = ssub.s32 (!%p698_p7), 2048, %s789_s16  ;;  %s485_s7 = ssub.s32 (!%p698_p7), 1536, %s789_s16 }
  0x28   : > { %413 = sbr.rel (%p698_p7) target bundleno = 71 (0x47), region = 40 }
  0x2d   : > { %v414_v1 = vlaneseq  ;;  %v428_v2 = vstv %s419_s6  ;;  %v420_v4 = vld [vmem:[%s812_s5] sm:$0xff]  ;;  %v840_v6 = vstv %s485_s7  ;;  %v421_v8 = vld [vmem:[%s812_s5 + $0x8] sm:$0xff]  ;;  %v445_v14 = vld [vmem:[#allocation2 + $0x10] sm:$0xff] }
  0x2e   : > { %v424_v5 = vld [vmem:[%s807_s29] sm:$0xff]  ;;  %v422_v10 = vld [vmem:[%s812_s5 + $0x10] sm:$0xff]  ;;  %v423_v12 = vld [vmem:[%s812_s5 + $0x18] sm:$0xff] }
  0x2f   : > { %v836_v3 = vand.u32 127, %v414_v1  ;;  %v425_v17 = vld [vmem:[%s807_s29 + $0x8] sm:$0xff]  ;;  %v426_v18 = vld [vmem:[%s807_s29 + $0x10] sm:$0xff]  ;;  %v427_v19 = vld [vmem:[%s807_s29 + $0x18] sm:$0xff] }
  0x30   : > { %v446_v21 = vld [vmem:[#allocation2] sm:$0xff]  ;;  %v447_v23 = vld [vmem:[#allocation2 + $0x18] sm:$0xff]  ;;  %v448_v25 = vld [vmem:[#allocation2 + $0x8] sm:$0xff] }
  0x31   : > { %vm429_vm0 = vcmp.lt.s32.totalorder %v836_v3, %v428_v2  ;;  %v844_v7 = vadd.s32 128, %v836_v3  ;;  %v848_v9 = vadd.s32 256, %v836_v3  ;;  %v852_v11 = vadd.s32 384, %v836_v3  ;;  %v461_v31 = vld [vmem:[#allocation3] sm:$0xff]  ;;  %v478_v41 = vld [vmem:[%s812_s5 + $0x28] sm:$0xff]  ;;  %v479_v42 = vld [vmem:[%s812_s5 + $0x30] sm:$0xff] }
  0x32   : > { %v433_v13 = vsel %vm429_vm0, %v420_v4, 0.0  ;;  %v437_v15 = vsel %vm429_vm0, %v424_v5, 0.0  ;;  %vm487_vm1 = vcmp.lt.s32.totalorder %v836_v3, %v840_v6  ;;  %v477_v32 = vld [vmem:[%s812_s5 + $0x20] sm:$0xff]  ;;  %v462_v44 = vld [vmem:[#allocation3 + $0x18] sm:$0xff]  ;;  %v463_v49 = vld [vmem:[#allocation3 + $0x8] sm:$0xff] }
  0x33   : > { %v449_v16 = vmul.f32 %v433_v13, %v433_v13  ;;  %vm430_vm2 = vcmp.lt.s32.totalorder %v844_v7, %v428_v2  ;;  %vm431_vm3 = vcmp.lt.s32.totalorder %v848_v9, %v428_v2  ;;  %vm432_vm4 = vcmp.lt.s32.totalorder %v852_v11, %v428_v2  ;;  %v464_v50 = vld [vmem:[#allocation3 + $0x10] sm:$0xff]  ;;  %v481_v52 = vld [vmem:[%s807_s29 + $0x20] sm:$0xff]  ;;  %v480_v57 = vld [vmem:[%s812_s5 + $0x38] sm:$0xff] }
  0x34   : > { %v434_v20 = vsel %vm430_vm2, %v421_v8, 0.0  ;;  %v435_v22 = vsel %vm431_vm3, %v422_v10, 0.0  ;;  %v436_v24 = vsel %vm432_vm4, %v423_v12, 0.0  ;;  %v441_v26 = vsub.f32 %v433_v13, %v437_v15  ;;  %v482_v62 = vld [vmem:[%s807_s29 + $0x28] sm:$0xff]  ;;  %v483_v63 = vld [vmem:[%s807_s29 + $0x30] sm:$0xff]  ;;  %v484_v0 = vld [vmem:[%s807_s29 + $0x38] sm:$0xff] }
  0x35   : > { %v453_v27 = vadd.f32 %v449_v16, %v445_v14  ;;  %v450_v28 = vmul.f32 %v434_v20, %v434_v20  ;;  %v451_v29 = vmul.f32 %v435_v22, %v435_v22  ;;  %v452_v30 = vmul.f32 %v436_v24, %v436_v24 }
  0x36   : > { %v465_v33 = vmul.f32 %v441_v26, %v441_v26  ;;  %v438_v34 = vsel %vm430_vm2, %v425_v17, 0.0  ;;  %v439_v35 = vsel %vm431_vm3, %v426_v18, 0.0  ;;  %v440_v36 = vsel %vm432_vm4, %v427_v19, 0.0 }
  0x37   : > { %v454_v37 = vadd.f32 %v450_v28, %v446_v21  ;;  %v455_v38 = vadd.f32 %v451_v29, %v447_v23  ;;  %v456_v39 = vadd.f32 %v452_v30, %v448_v25  ;;  %v442_v40 = vsub.f32 %v434_v20, %v438_v34 }
  0x38   : > { %v469_v43 = vadd.f32 %v465_v33, %v461_v31  ;;  %v443_v45 = vsub.f32 %v435_v22, %v439_v35  ;;  %v444_v46 = vsub.f32 %v436_v24, %v440_v36  ;;  %v491_v47 = vsel %vm487_vm1, %v477_v32, 0.0 }
  0x39   : > { %v466_v48 = vmul.f32 %v442_v40, %v442_v40  ;;  %v507_v51 = vmul.f32 %v491_v47, %v491_v47  ;;  %vm488_vm5 = vcmp.lt.s32.totalorder %v844_v7, %v840_v6  ;;  %vm489_vm6 = vcmp.lt.s32.totalorder %v848_v9, %v840_v6 }
  0x3a   : > { %v467_v53 = vmul.f32 %v443_v45, %v443_v45  ;;  %v468_v54 = vmul.f32 %v444_v46, %v444_v46  ;;  %v492_v55 = vsel %vm488_vm5, %v478_v41, 0.0  ;;  %v493_v56 = vsel %vm489_vm6, %v479_v42, 0.0 }
  0x3b   : > { %v470_v58 = vadd.f32 %v466_v48, %v462_v44  ;;  %v511_v59 = vadd.f32 %v507_v51, %v453_v27  ;;  %v508_v60 = vmul.f32 %v492_v55, %v492_v55  ;;  %v509_v61 = vmul.f32 %v493_v56, %v493_v56 }
  0x3c   : > { %v471_v1 = vadd.f32 %v467_v53, %v463_v49  ;;  %v472_v2 = vadd.f32 %v468_v54, %v464_v50  ;;  %vm490_vm7 = vcmp.lt.s32.totalorder %v852_v11, %v840_v6  ;;  %v495_v4 = vsel %vm487_vm1, %v481_v52, 0.0 }
  0x3d   : > { %515 = vst [vmem:[#allocation2 + $0x10] sm:$0xff] %v511_v59  ;;  %v512_v5 = vadd.f32 %v508_v60, %v454_v37  ;;  %v513_v8 = vadd.f32 %v509_v61, %v455_v38  ;;  %v494_v10 = vsel %vm490_vm7, %v480_v57, 0.0  ;;  %v499_v12 = vsub.f32 %v491_v47, %v495_v4 }
  0x3e   : > { %v510_v13 = vmul.f32 %v494_v10, %v494_v10  ;;  %v496_v14 = vsel %vm488_vm5, %v482_v62, 0.0  ;;  %v497_v15 = vsel %vm489_vm6, %v483_v63, 0.0  ;;  %v498_v16 = vsel %vm490_vm7, %v484_v0, 0.0 }
  0x3f   : > { %516 = vst [vmem:[#allocation2] sm:$0xff] %v512_v5  ;;  %517 = vst [vmem:[#allocation2 + $0x18] sm:$0xff] %v513_v8  ;;  %v523_v11 = vmul.f32 %v499_v12, %v499_v12  ;;  %v500_v3 = vsub.f32 %v492_v55, %v496_v14  ;;  %v501_v17 = vsub.f32 %v493_v56, %v497_v15 }
  0x40   : > { %v502_v18 = vsub.f32 %v494_v10, %v498_v16  ;;  %v514_v19 = vadd.f32 %v510_v13, %v456_v39 }
  0x41   : > { %v527_v20 = vadd.f32 %v523_v11, %v469_v43  ;;  %v524_v21 = vmul.f32 %v500_v3, %v500_v3  ;;  %v525_v22 = vmul.f32 %v501_v17, %v501_v17 }
  0x42   : > { %v526_v23 = vmul.f32 %v502_v18, %v502_v18  ;;  %518 = vst [vmem:[#allocation2 + $0x8] sm:$0xff] %v514_v19 }
  0x43   : > { %531 = vst [vmem:[#allocation3] sm:$0xff] %v527_v20  ;;  %v528_v7 = vadd.f32 %v524_v21, %v470_v58  ;;  %v529_v24 = vadd.f32 %v525_v22, %v471_v1 }
  0x44   : > { %v530_v25 = vadd.f32 %v526_v23, %v472_v2 }
  0x45   : > { %532 = vst [vmem:[#allocation3 + $0x18] sm:$0xff] %v528_v7  ;;  %533 = vst [vmem:[#allocation3 + $0x8] sm:$0xff] %v529_v24 }
  0x46   : > { %534 = vst [vmem:[#allocation3 + $0x10] sm:$0xff] %v530_v25 }
  0x47 PF: > { %v538_v6 = vld [vmem:[#allocation2 + $0x10] sm:$0xff]  ;;  %v539_v9 = vld [vmem:[#allocation2] sm:$0xff]  ;;  %v540_v26 = vld [vmem:[#allocation2 + $0x18] sm:$0xff]  ;;  %vm547_vm8 = vcmask 7168  }
  0x48   : > { %v542_v27 = vadd.f32 %v539_v9, %v538_v6 }
  0x49   : > { %v541_v30 = vld [vmem:[#allocation2 + $0x8] sm:$0xff] }
  0x4a   : > { %v549_v28 = vld [vmem:[#allocation3] sm:$0xff]  ;;  %v543_v33 = vadd.f32 %v542_v27, %v540_v26 }
  0x4c   : > { %v550_v29 = vld [vmem:[#allocation3 + $0x18] sm:$0xff]  ;;  %v551_v31 = vld [vmem:[#allocation3 + $0x8] sm:$0xff]  ;;  %v544_v36 = vadd.f32 %v543_v33, %v541_v30 }
  0x4d   : > { %v553_v32 = vadd.f32 %v550_v29, %v549_v28  ;;  %v552_v34 = vld [vmem:[#allocation3 + $0x10] sm:$0xff] }
  0x4e   : > { %545 = vadd.xlane.f32.xlu0 %v544_v36 }
  0x4f   : > { %v554_v35 = vadd.f32 %v553_v32, %v551_v31 }
  0x51   : > { %v555_v37 = vadd.f32 %v554_v35, %v552_v34 }
  0x53   : > { %556 = vadd.xlane.f32.xlu0 %v555_v37 }
  0xd7   : > { %v546_v38 = vpop.xlane.xlu0 %545 }
  0xd8   : > { %548 = vst.msk [vmem:[%s295_s21] sm:$0xff] %vm547_vm8, %v546_v38 }
  0xdc   : > { %v557_v39 = vpop.xlane.xlu0 %556 }
  0xdd   : > { %558 = vst.msk [vmem:[%s301_s24] sm:$0xff] %vm547_vm8, %v557_v39 }
  0xde PF: > { %s14_s14 = sadd.s32 1, %s748_s14   ;;  %s930_s12 = smov %s744_s13 }
  0xdf   : > { %p11_p8 = scmp.ge.s32.totalorder %s14_s14, 4   ;;  %s931_s13 = smov %s933_s15 }
  0xe1   :  { %13 = sbr.rel (!%p11_p8) target bundleno = 2 (0x2), region = 89 }

</bundles_post_ra>
